<compile_context>
chip_gen: v7x
topology: tpu7x:2x2x1
jax: 0.10.0
libtpu: 0.0.40
codegen_flags: <defaults>
</compile_context>

<pallas_src>
import functools

import jax
import jax.numpy as jnp
from jax.experimental import pallas as pl
from jax.experimental.pallas import tpu as pltpu


def _round_up(x, m):
    return ((x + m - 1) // m) * m


def additive_attention_kernel(h_ref, wt_ref, b_ref, q_ref, o_ref, *,
                              approx_reciprocal=True):
    # h_ref:  (TB, S, E)   TB batch rows, full sequence + embedding per row
    # wt_ref: (E, A_pad)   W^T, zero-padded along A to a multiple of 128
    # b_ref:  (1, A_pad)   bias (f32)
    # q_ref:  (1, A_pad)   query vector (f32)
    # o_ref:  (TB, E)
    tb, s, e = h_ref.shape
    a_pad = wt_ref.shape[1]

    h3 = h_ref[...]                                            # (TB, S, E)
    h2 = h3.reshape(tb * s, e)                                 # free if S%8==0

    # Projection: one large MXU matmul with f32 accumulation; bias + tanh run
    # on full 128-lane vregs (A zero-padded; tanh(0) lanes are killed by the
    # zero-padded q, so scores are unchanged).
    proj = jnp.dot(h2, wt_ref[...], preferred_element_type=jnp.float32)
    t = jnp.tanh(proj + b_ref[...])                            # (TB*S, A_pad)

    # scores = t @ q as a VPU multiply + lane reduce (no 1-useful-lane MXU
    # matmul), landing directly in a lane-dense (TB, S) layout.
    t3 = t.reshape(tb, s, a_pad)                               # free if S%8==0
    scores = jnp.sum(t3 * q_ref[...], axis=-1)                 # (TB, S)

    # Per-batch-row softmax over the sequence (lane reductions).
    m = jnp.max(scores, axis=-1, keepdims=True)                # (TB, 1)
    p = jnp.exp(scores - m)                                    # (TB, S)
    denom = jnp.sum(p, axis=-1, keepdims=True)                 # (TB, 1)
    if approx_reciprocal:
        w = p * pl.reciprocal(denom, approx=True)              # EUP, ~free
    else:
        w = p / denom

    # Weighted sum over the sequence, reusing the already-resident h tile
    # (no second HBM read of h), kept in the 3-D layout.
    r = jnp.sum(w[:, :, None] * h3.astype(jnp.float32), axis=1)   # (TB, E)
    o_ref[...] = r.astype(o_ref.dtype)


def prepare_params(weight, bias, q_w, *, matmul_dtype=None):
    """One-time parameter packing (do at parameter-load time, not per call):
    transpose W and zero-pad the attention dim A up to a multiple of 128.
    `matmul_dtype=jnp.bfloat16` is beneficial on v5e, v6e and v7x alike (bf16
    MXU inputs, f32 accumulation, f32 elementwise tail); bias/q stay f32."""
    A, E = weight.shape
    A_pad = _round_up(A, 128)
    w = weight if matmul_dtype is None else weight.astype(matmul_dtype)
    wt = jnp.zeros((E, A_pad), w.dtype).at[:, :A].set(w.T)
    b2 = jnp.zeros((1, A_pad), jnp.float32).at[:, :A].set(bias.astype(jnp.float32))
    q2 = jnp.zeros((1, A_pad), jnp.float32).at[:, :A].set(q_w.astype(jnp.float32))
    return wt, b2, q2


def _pick_tile_b(B, S, E, A_pad, h_itemsize, vmem_limit_bytes, target_rows):
    """Batch-tile size: sublane-aligned, VMEM-aware (counts h tile, f32
    proj/tanh intermediates, f32 weighted-h, and output double-buffer), and
    keeps >= 2 (>= 4) grid steps when the batch allows (v7x megacore)."""
    if B <= 8:
        return B
    tb = max(8, _round_up(pl.cdiv(target_rows, S), 8))
    tb = min(tb, _round_up(B, 8))
    if B >= 32:                       # >= 4 grid steps when the batch allows
        tb = min(tb, _round_up(pl.cdiv(B, 4), 8))
    elif B >= 16:                     # >= 2 grid steps
        tb = min(tb, _round_up(pl.cdiv(B, 2), 8))

    def vmem_bytes(t):
        rows = t * S
        return (2 * rows * E * h_itemsize      # h tile (double buffered)
                + 2 * rows * A_pad * 4         # proj + tanh (f32)
                + rows * E * 4                 # f32 weighted-h intermediate
                + 2 * t * E * 4                # output tile (double buffered)
                + (E + 2) * A_pad * 4)         # wt / bias / q residents

    budget = (vmem_limit_bytes * 3) // 5       # leave headroom for spills
    while tb > 8 and vmem_bytes(tb) > budget:
        tb -= 8
    return tb


@functools.partial(jax.jit,
                   static_argnames=("target_rows", "vmem_limit_bytes",
                                    "approx_reciprocal"))
def additive_attention(h, wt, b2, q2, *, target_rows=4096,
                       vmem_limit_bytes=None, approx_reciprocal=True):
    """h: [B, S, E]; (wt, b2, q2) from prepare_params() -> [B, E]."""
    B, S, E = h.shape
    A_pad = wt.shape[1]
    out_dtype = h.dtype

    if vmem_limit_bytes is None:
        # Scoped-VMEM budget from physical VMEM: ~48 MiB on v7x (64 MiB/TC),
        # ~96 MiB on v5e/v6e (128 MiB); conservative fallback if the query
        # is unavailable.
        try:
            cap = int(pltpu.get_tpu_info().vmem_capacity_bytes)
        except Exception:
            cap = 64 * 1024 * 1024
        vmem_limit_bytes = min(96 * 1024 * 1024, (cap * 3) // 4)

    tb = _pick_tile_b(B, S, E, A_pad, jnp.dtype(h.dtype).itemsize,
                      vmem_limit_bytes, target_rows)
    if tb >= B:
        tb, grid_b = B, 1              # block == full batch (valid block spec)
    else:
        grid_b = pl.cdiv(B, tb)
    B_pad = grid_b * tb                # only the *output* is padded; h is read
                                       # in place (trailing partial block rows
                                       # are undefined and sliced off below).

    kernel = functools.partial(additive_attention_kernel,
                               approx_reciprocal=approx_reciprocal)
    out = pl.pallas_call(
        kernel,
        out_shape=jax.ShapeDtypeStruct((B_pad, E), out_dtype),
        grid_spec=pltpu.PrefetchScalarGridSpec(
            num_scalar_prefetch=0,
            grid=(grid_b,),
            in_specs=[
                # h tile: last two dims equal the full array dims, so the
                # (8,128) rule doesn't apply and no wrapper-side pad/reshape
                # of h in HBM is needed.
                pl.BlockSpec((tb, S, E), lambda i: (i, 0, 0)),
                pl.BlockSpec((E, A_pad), lambda i: (0, 0)),     # W^T
                pl.BlockSpec((1, A_pad), lambda i: (0, 0)),     # bias
                pl.BlockSpec((1, A_pad), lambda i: (0, 0)),     # q
            ],
            out_specs=pl.BlockSpec((tb, E), lambda i: (i, 0)),
        ),
        compiler_params=pltpu.CompilerParams(
            dimension_semantics=("parallel",),   # batch axis -> megacore
            vmem_limit_bytes=int(vmem_limit_bytes)),
    )(h, wt, b2, q2)
    return out[:B] if B_pad != B else out


def additive_attention_ref(h, weight, bias, q_w):
    proj = jnp.einsum("bse,ae->bsa", h, weight) + bias
    t = jnp.tanh(proj)
    scores = jnp.einsum("bsa,a->bs", t, q_w)
    w = jax.nn.softmax(scores, axis=-1)
    return jnp.sum(w[..., None] * h, axis=-2)


if __name__ == "__main__":
    B, S, E, A = 2, 8, 32, 16   # batch, seq, embed_size, attention_dim

    key = jax.random.PRNGKey(0)
    k_h, k_w, k_q = jax.random.split(key, 3)

    h = jax.random.normal(k_h, (B, S, E), dtype=jnp.float32)

    # Deterministic init mirroring the PyTorch module: xavier_uniform_ weight,
    # zero bias, uniform(-0.01, 0.01) q_w.
    xavier_bound = (6.0 / (A + E)) ** 0.5
    weight = jax.random.uniform(k_w, (A, E), jnp.float32,
                                minval=-xavier_bound, maxval=xavier_bound)
    bias = jnp.zeros((A,), jnp.float32)
    q_w = jax.random.uniform(k_q, (A,), jnp.float32, minval=-0.01, maxval=0.01)

    ref = additive_attention_ref(h, weight, bias, q_w)

    # f32 path.
    wt, b2, q2 = prepare_params(weight, bias, q_w)
    out = jax.block_until_ready(additive_attention(h, wt, b2, q2))
    assert out.shape == (B, E)
    # Tolerance accommodates the approximate EUP reciprocal in the softmax.
    assert jnp.allclose(out, ref, atol=5e-3, rtol=5e-3)

    # bf16 MXU-input path (valid on v5e/v6e/v7x): the h cast happens once
    # here at the "producer", not inside the per-call wrapper.
    wt16, b216, q216 = prepare_params(weight, bias, q_w,
                                      matmul_dtype=jnp.bfloat16)
    h16 = h.astype(jnp.bfloat16)
    out16 = jax.block_until_ready(additive_attention(h16, wt16, b216, q216))
    assert out16.shape == (B, E)
    assert jnp.allclose(out16.astype(jnp.float32), ref, atol=5e-2, rtol=5e-2)

    # A slightly larger shape exercising the multi-step grid and a lane-dense
    # embedding (4 grid steps, E = 128).
    B2, S2, E2, A2 = 32, 16, 128, 96
    kk = jax.random.split(jax.random.PRNGKey(1), 3)
    h_big = jax.random.normal(kk[0], (B2, S2, E2), dtype=jnp.float32)
    w_big = jax.random.uniform(kk[1], (A2, E2), jnp.float32,
                               minval=-0.05, maxval=0.05)
    b_big = jnp.zeros((A2,), jnp.float32)
    q_big = jax.random.uniform(kk[2], (A2,), jnp.float32,
                               minval=-0.01, maxval=0.01)
    wtb, bb, qb = prepare_params(w_big, b_big, q_big)
    out_big = jax.block_until_ready(additive_attention(h_big, wtb, bb, qb))
    ref_big = additive_attention_ref(h_big, w_big, b_big, q_big)
    assert out_big.shape == (B2, E2)
    assert jnp.allclose(out_big, ref_big, atol=3e-2, rtol=3e-2)

    print("KERNEL_OK")
</pallas_src>

<mosaic_0001>
module attributes {stable_mosaic.version = 11 : i64} {
  func.func @additive_attention_kernel(%arg0: i32, %arg1: memref<2x8x32xf32, #tpu.memory_space<vmem>>, %arg2: memref<32x128xf32, #tpu.memory_space<vmem>>, %arg3: memref<1x128xf32, #tpu.memory_space<vmem>>, %arg4: memref<1x128xf32, #tpu.memory_space<vmem>>, %arg5: memref<2x32xf32, #tpu.memory_space<vmem>>) attributes {dimension_semantics = [#tpu.dimension_semantics<parallel>], iteration_bounds = array<i64: 1>, scalar_prefetch = 0 : i64, scratch_operands = 0 : i64, tpu.core_type = #tpu.core_type<tc>, window_params = [{transform_indices = @transform_0, window_bounds = array<i64: 2, 8, 32>}, {pipeline_mode = #tpu.pipeline_mode<synchronous>, transform_indices = @transform_1, window_bounds = array<i64: 32, 128>}, {pipeline_mode = #tpu.pipeline_mode<synchronous>, transform_indices = @transform_2, window_bounds = array<i64: 1, 128>}, {pipeline_mode = #tpu.pipeline_mode<synchronous>, transform_indices = @transform_3, window_bounds = array<i64: 1, 128>}, {transform_indices = @transform_4, window_bounds = array<i64: 2, 32>}]} {
    %c0 = arith.constant 0 : index
    %c0_0 = arith.constant 0 : index
    %c0_1 = arith.constant 0 : index
    %0 = vector.load %arg1[%c0, %c0_0, %c0_1] : memref<2x8x32xf32, #tpu.memory_space<vmem>>, vector<2x8x32xf32>
    %1 = vector.shape_cast %0 : vector<2x8x32xf32> to vector<16x32xf32>
    %c0_2 = arith.constant 0 : index
    %c0_3 = arith.constant 0 : index
    %2 = vector.load %arg2[%c0_2, %c0_3] : memref<32x128xf32, #tpu.memory_space<vmem>>, vector<32x128xf32>
    %cst = arith.constant dense<0.000000e+00> : vector<16x128xf32>
    %3 = tpu.matmul %1, %2, %cst {dimension_numbers = #tpu.dot_dimension_numbers<[1], [0], [0], [1], [0, 0, 1, 1], [], []>} : vector<16x32xf32>, vector<32x128xf32>, vector<16x128xf32> -> vector<16x128xf32>
    %c0_4 = arith.constant 0 : index
    %c0_5 = arith.constant 0 : index
    %4 = vector.load %arg3[%c0_4, %c0_5] : memref<1x128xf32, #tpu.memory_space<vmem>>, vector<1x128xf32>
    %5 = vector.broadcast %4 : vector<1x128xf32> to vector<16x128xf32>
    %6 = arith.addf %3, %5 : vector<16x128xf32>
    %7 = math.tanh %6 : vector<16x128xf32>
    %8 = vector.shape_cast %7 : vector<16x128xf32> to vector<2x8x128xf32>
    %c0_6 = arith.constant 0 : index
    %c0_7 = arith.constant 0 : index
    %9 = vector.load %arg4[%c0_6, %c0_7] : memref<1x128xf32, #tpu.memory_space<vmem>>, vector<1x128xf32>
    %10 = vector.shape_cast %9 : vector<1x128xf32> to vector<1x1x128xf32>
    %11 = vector.broadcast %10 : vector<1x1x128xf32> to vector<2x8x128xf32>
    %12 = arith.mulf %8, %11 : vector<2x8x128xf32>
    %cst_8 = arith.constant dense<0.000000e+00> : vector<2x8xf32>
    %13 = vector.multi_reduction <add>, %12, %cst_8 [2] : vector<2x8x128xf32> to vector<2x8xf32>
    %cst_9 = arith.constant dense<0xFF800000> : vector<2xf32>
    %14 = vector.multi_reduction <maximumf>, %13, %cst_9 [1] : vector<2x8xf32> to vector<2xf32>
    %15 = vector.shape_cast %14 : vector<2xf32> to vector<2x1xf32>
    %16 = vector.broadcast %15 : vector<2x1xf32> to vector<2x8xf32>
    %17 = arith.subf %13, %16 : vector<2x8xf32>
    %18 = math.exp %17 : vector<2x8xf32>
    %cst_10 = arith.constant dense<0.000000e+00> : vector<2xf32>
    %19 = vector.multi_reduction <add>, %18, %cst_10 [1] : vector<2x8xf32> to vector<2xf32>
    %20 = vector.shape_cast %19 : vector<2xf32> to vector<2x1xf32>
    %21 = tpu.reciprocal %20 {approx = true} : vector<2x1xf32> -> vector<2x1xf32>
    %22 = vector.broadcast %21 : vector<2x1xf32> to vector<2x8xf32>
    %23 = arith.mulf %18, %22 : vector<2x8xf32>
    %24 = vector.shape_cast %23 : vector<2x8xf32> to vector<2x8x1xf32>
    %25 = vector.broadcast %24 : vector<2x8x1xf32> to vector<2x8x32xf32>
    %26 = arith.mulf %25, %0 : vector<2x8x32xf32>
    %cst_11 = arith.constant dense<0.000000e+00> : vector<2x32xf32>
    %27 = vector.multi_reduction <add>, %26, %cst_11 [1] : vector<2x8x32xf32> to vector<2x32xf32>
    %c0_12 = arith.constant 0 : index
    %c0_13 = arith.constant 0 : index
    %28 = vector.load %arg5[%c0_12, %c0_13] : memref<2x32xf32, #tpu.memory_space<vmem>>, vector<2x32xf32>
    tpu.vector_store %arg5[%c0_12, %c0_13], %27 {strides = array<i32>} : memref<2x32xf32, #tpu.memory_space<vmem>>, vector<2x32xf32>,
    return
  }
  func.func @transform_0(%arg0: i32) -> (i32, i32, i32) {
    %c0_i32 = arith.constant 0 : i32
    %c0_i32_0 = arith.constant 0 : i32
    %c0_i32_1 = arith.constant 0 : i32
    return %arg0, %c0_i32, %c0_i32_0 : i32, i32, i32
  }
  func.func @transform_1(%arg0: i32) -> (i32, i32) {
    %c0_i32 = arith.constant 0 : i32
    %c0_i32_0 = arith.constant 0 : i32
    %c0_i32_1 = arith.constant 0 : i32
    return %c0_i32, %c0_i32_0 : i32, i32
  }
  func.func @transform_2(%arg0: i32) -> (i32, i32) {
    %c0_i32 = arith.constant 0 : i32
    %c0_i32_0 = arith.constant 0 : i32
    %c0_i32_1 = arith.constant 0 : i32
    return %c0_i32, %c0_i32_0 : i32, i32
  }
  func.func @transform_3(%arg0: i32) -> (i32, i32) {
    %c0_i32 = arith.constant 0 : i32
    %c0_i32_0 = arith.constant 0 : i32
    %c0_i32_1 = arith.constant 0 : i32
    return %c0_i32, %c0_i32_0 : i32, i32
  }
  func.func @transform_4(%arg0: i32) -> (i32, i32) {
    %c0_i32 = arith.constant 0 : i32
    %c0_i32_0 = arith.constant 0 : i32
    return %arg0, %c0_i32 : i32, i32
  }
}

</mosaic_0001>

<bundles_post_ra>
// kernel: additive_attention.1
= control target key start
LH: loop header
LB: loop body
LE: loop exit
PB: predicated region body
PF: predicated region fallthrough
CT: control target
= control target key end

     0   :  { %9 = vsyncpa [#allocation3], 0  ;;  %s484_s0 = inlined_call_operand.hbm [shape: f32[2,8,32], index: 0, kind: input, shape index: {}]   ;;  %s485_s1 = inlined_call_operand.hbm [shape: f32[32,128], index: 1, kind: input, shape index: {}]   ;;  %s486_s2 = inlined_call_operand.vmem [shape: f32[1,128], index: 2, kind: input, shape index: {}]   ;;  %s487_s3 = inlined_call_operand.vmem [shape: f32[1,128], index: 3, kind: input, shape index: {}]   ;;  %s488_s4 = inlined_call_operand.hbm [shape: f32[2,32], index: 4, kind: output, shape index: {}]  }
   0x1   :  { %10 = vsyncpa [#allocation6], 0 }
   0x2   :  { %11 = vsyncpa [#allocation4], 0  ;;  %s394_s15 = smov [#allocation2]   ;;  %s322_s19 = scalar_lea.hbm %s484_s0, 256 }
   0x3   :  { %s17_s16 = sshll.u32 %s394_s15, 4  ;;  %p323_p0 = scmp.ne.s32.totalorder %s484_s0, %s322_s19  ;;  %s18_s16 = int_to_ptr.vmem [resolvable:$true] %s17_s16 }
   0x4   :  { %p326_p1 = scmp.lt.u32.totalorder %s322_s19, %s484_s0 }
   0x6   :  { %p328_p2 = pnand %p326_p1, %p323_p0 }
   0x8   :  { %331 = shalt.err (!%p328_p2)
}
   0x9   :  { %s332_s24 = scalar_lea.vmem %s18_s16, 256  ;;  %p337_p4 = scmp.lt.s32.totalorder %s18_s16, %s18_s16 }
   0xa   :  { %p333_p3 = scmp.ne.s32.totalorder %s18_s16, %s332_s24  ;;  %p338_p5 = scmp.lt.s32.totalorder %s332_s24, %s332_s24 }
   0xc   :  { %p339_p6 = por %p338_p5, %p337_p4 }
   0xe   :  { %p340_p7 = pnand %p339_p6, %p333_p3 }
  0x10   :  { %343 = shalt.err (!%p340_p7)
}
  0x11   :  { %s395_s25 = smov 128   ;;  %s396_s26 = smov 8  }
  0x12   :  { %23 = dma.hbm_to_vmem [thread:$0]  %s484_s0, 256, %s18_s16, [#allocation3], %s395_s25, %s395_s25, %s396_s26  }
  0x13   :  { %s397_s29 = smov [#allocation5]   ;;  %s344_s7 = scalar_lea.hbm %s485_s1, 512 }
  0x14   :  { %s29_s30 = sshll.u32 %s397_s29, 4  ;;  %p345_p8 = scmp.ne.s32.totalorder %s485_s1, %s344_s7  ;;  %s30_s30 = int_to_ptr.vmem [resolvable:$true] %s29_s30 }
  0x15   :  { %p348_p9 = scmp.lt.u32.totalorder %s344_s7, %s485_s1 }
  0x17   :  { %p350_p10 = pnand %p348_p9, %p345_p8 }
  0x19   :  { %353 = shalt.err (!%p350_p10)
}
  0x1a   :  { %s354_s12 = scalar_lea.vmem %s30_s30, 512  ;;  %p359_p12 = scmp.lt.s32.totalorder %s30_s30, %s30_s30 }
  0x1b   :  { %p355_p11 = scmp.ne.s32.totalorder %s30_s30, %s354_s12  ;;  %p360_p13 = scmp.lt.s32.totalorder %s354_s12, %s354_s12 }
  0x1d   :  { %p361_p0 = por %p360_p13, %p359_p12 }
  0x1f   :  { %p362_p1 = pnand %p361_p0, %p355_p11 }
  0x21   :  { %365 = shalt.err (!%p362_p1)
}
  0x22   :  { %35 = dma.hbm_to_vmem [thread:$0]  %s485_s1, 512, %s30_s30, [#allocation6], %s395_s25, %s395_s25, %s396_s26  }
  0x23   :  { %388 = dma.done.wait [#allocation3], 256  }
  0x24   :  { %389 = vsyncadd [#allocation3], 4294967040 }
  0x25   :  { %390 = dma.done.wait [#allocation6], 512  }
  0x26   :  { %391 = vsyncadd [#allocation6], 4294966784  ;;  %vm59_vm0 = vcmask 261120   ;;  %v48_v0 = vld [vmem:[#allocation5] sm:$0xff]  ;;  %v49_v1 = vld [vmem:[#allocation5 + $0x8] sm:$0xff]  ;;  %v158_v18 = vlaneseq  ;;  %vm168_vm1 = vcmask 1041409  }
  0x27   :  { %v50_v2 = vld [vmem:[#allocation5 + $0x10] sm:$0xff]  ;;  %v296_v3 = vpack.c.bf16 %v49_v1, %v48_v0  ;;  %v51_v4 = vld [vmem:[#allocation5 + $0x18] sm:$0xff]  ;;  %vm171_vm2 = vcmask 58368   ;;  %v398_v28 = vmov 0   ;;  %vm257_vm3 = vcmask 254976  }
  0x28   :  { %v449_v5 = vld [vmem:[#allocation2] sm:$0xff]  ;;  %v300_v6 = vpack.c.bf16 %v51_v4, %v50_v2  ;;  %v453_v7 = vld [vmem:[#allocation2 + $0x8] sm:$0xff]  ;;  %v159_v19 = vand.u32 127, %v158_v18  ;;  %v161_v20 = vshrl.u32 %v158_v18, 7  ;;  %311 = vset.pattern.permute.xlu0 %v398_v28  ;;  %310 = vset.pattern.permute.xlu1 %v398_v28 }
  0x29   :  { %293 = vmatprep.mubr.msk.f32.mxu0 %vm59_vm0, %v449_v5  ;;  %297 = vmatprep.subr.bf16.mxu0 %v296_v3  ;;  %v275_v8 = vld [vmem:[%s486_s2] ss:$0 sm:$0xff]  ;;  %s399_s2 = smov [#allocation7]  }
  0x2a   :  { %299 = vmatpush3.bf16.msra.mxu0 %v296_v3  ;;  %v278_v13 = vld [vmem:[%s487_s3] ss:$0 sm:$0xff]  ;;  %v162_v22 = vsub.s32 %v159_v19, %v161_v20  ;;  %v178_v29 = vsub.s32 0, %v161_v20  ;;  %v182_v30 = vsub.s32 1, %v161_v20  ;;  %s265_s3 = sshll.u32 %s399_s2, 4  ;;  %s266_s3 = int_to_ptr.vmem [resolvable:$true] %s265_s3 }
  0x2b   :  { %301 = vmatprep.subr.bf16.mxu0 %v300_v6  ;;  %s366_s17 = scalar_lea.vmem %s266_s3, 32  ;;  %p371_p3 = scmp.lt.s32.totalorder %s266_s3, %s266_s3 }
  0x2c   :  { %p367_p2 = scmp.ne.s32.totalorder %s266_s3, %s366_s17  ;;  %p372_p4 = scmp.lt.s32.totalorder %s366_s17, %s366_s17 }
  0x2e   :  { %303 = vmatpush3.bf16.msra.mxu0 %v300_v6  ;;  %p373_p5 = por %p372_p4, %p371_p3 }
  0x30   :  { %p374_p6 = pnand %p373_p5, %p367_p2 }
  0x31   :  { %294 = vmatmul.mubr.msk.f32.vlgmr.msra.gmra.mrb[0].mxu0 %vm59_vm0, %v453_v7 }
 0x104   :  { %v295_v9 = vpop.f32.mrb[0].mxu0 }
 0x105   :  { %v132_v10 = vpop.f32.mrb[1].mxu0  ;;  %v138_v11 = vadd.f32 %v295_v9, %v275_v8 }
 0x106   :  { %v133_v12 = vadd.f32 %v275_v8, %v132_v10 }
 0x108   :  { %312 = vtanh.f32 %v133_v12 }
 0x109   :  { %314 = vtanh.f32 %v138_v11 }
 0x112   :  { %v313_v14 = vpop.eup %312 }
 0x113   :  { %v150_v15 = vmul.f32 %v313_v14, %v278_v13  ;;  %v315_v16 = vpop.eup %314 }
 0x114   :  { %v151_v17 = vmul.f32 %v315_v16, %v278_v13 }
 0x115   :  { %152 = vadd.xlane.f32.xlu0 %v150_v15 }
 0x119   :  { %154 = vadd.xlane.f32.xlu0 %v151_v17 }
 0x1a2   :  { %v153_v21 = vpop.xlane.xlu0 %152 }
 0x1a3   :  { %v163_v24 = vrot.slane %v153_v21, %v162_v22 }
 0x1a6   :  { %v155_v23 = vpop.xlane.xlu0 %154 }
 0x1a7   :  { %v167_v25 = vrot.slane %v155_v23, %v162_v22 }
 0x1a9   :  { %v169_v26 = vsel %vm168_vm1, %v167_v25, %v163_v24 }
 0x1aa   :  { %v172_v27 = vsel %vm171_vm2, %v169_v26, -inf }
 0x1ab   :  { %173 = vmax.xlane.f32.xlu1 %v172_v27 }
 0x238   :  { %v174_v31 = vpop.xlane.xlu1 %173 }
 0x239   :  { %v179_v32 = vrot.slane %v174_v31, %v178_v29  ;;  %v183_v33 = vrot.slane %v174_v31, %v182_v30 }
 0x23b   :  { %v186_v34 = vsub.f32 %v153_v21, %v179_v32  ;;  %v187_v35 = vsub.f32 %v155_v23, %v183_v33 }
 0x23d   :  { %v188_v36 = vmul.f32 1.442695, %v186_v34  ;;  %v190_v37 = vmul.f32 1.442695, %v187_v35 }
 0x23f   :  { %316 = vpow2.f32 %v188_v36 }
 0x240   :  { %318 = vpow2.f32 %v190_v37 }
 0x249   :  { %v317_v38 = vpop.eup %316 }
 0x24a   :  { %v319_v39 = vpop.eup %318  ;;  %195 = vperm.xlu1 %310, %v317_v38  }
 0x24b   :  { %198 = vperm.xlu0 %311, %v319_v39  }
 0x2c9   :  { %v196_v40 = vpop.permute.xlu1 %195 }
 0x2ca   :  { %v199_v41 = vpop.permute.xlu0 %198  ;;  %v203_v42 = vrot.slane %v196_v40, %v162_v22 }
 0x2cb   :  { %v207_v43 = vrot.slane %v199_v41, %v162_v22 }
 0x2cd   :  { %v208_v44 = vsel %vm168_vm1, %v207_v43, %v203_v42 }
 0x2ce   :  { %v210_v45 = vsel %vm171_vm2, %v208_v44, 0.0 }
 0x2cf   :  { %211 = vadd.xlane.f32.xlu1 %v210_v45 }
 0x35c   :  { %v212_v46 = vpop.xlane.xlu1 %211 }
 0x35d   :  { %320 = vrcp.f32 %v212_v46 }
 0x367   :  { %v321_v47 = vpop.eup %320 }
 0x368   :  { %v218_v48 = vrot.slane %v321_v47, %v178_v29  ;;  %v222_v50 = vrot.slane %v321_v47, %v182_v30 }
 0x36a   :  { %v225_v49 = vmul.f32 %v317_v38, %v218_v48  ;;  %v226_v51 = vmul.f32 %v319_v39, %v222_v50 }
 0x36c   :  { %229 = vperm.xlu0 %311, %v225_v49  }
 0x370   :  { %234 = vperm.xlu0 %311, %v226_v51  }
 0x3eb   :  { %v230_v52 = vpop.permute.xlu0 %229 }
 0x3ec   :  { %v237_v53 = vmul.f32 %v230_v52, %v449_v5 }
 0x3ee   :  { %v239_v54 = vsel %vm59_vm0, %v237_v53, 0.0 }
 0x3ef   :  { %v240_v55 = vrot.slane %v239_v54, 4  ;;  %v235_v56 = vpop.permute.xlu0 %234 }
 0x3f0   :  { %v238_v57 = vmul.f32 %v235_v56, %v453_v7 }
 0x3f1   :  { %v241_v58 = vadd.f32 %v240_v55, %v239_v54 }
 0x3f2   :  { %v246_v59 = vsel %vm59_vm0, %v238_v57, 0.0 }
 0x3f3   :  { %v242_v60 = vrot.slane %v241_v58, 2  ;;  %v247_v61 = vrot.slane %v246_v59, 4 }
 0x3f5   :  { %v243_v62 = vadd.f32 %v242_v60, %v241_v58  ;;  %v248_v63 = vadd.f32 %v247_v61, %v246_v59 }
 0x3f7   :  { %v249_v0 = vrot.slane %v248_v63, 2  ;;  %v244_v1 = vrot.slane %v243_v62, 1 }
 0x3f9   :  { %v250_v2 = vadd.f32 %v249_v0, %v248_v63  ;;  %v245_v4 = vadd.f32 %v244_v1, %v243_v62 }
 0x3fb   :  { %v251_v3 = vrot.slane %v250_v2, 1 }
 0x3fd   :  { %v252_v5 = vadd.f32 %v251_v3, %v250_v2 }
 0x3ff   :  { %v255_v6 = vsel %vm168_vm1, %v252_v5, %v245_v4 }
 0x400   :  { %258 = vst.msk [vmem:[#allocation7] sm:$0x3] %vm257_vm3, %v255_v6 }
 0x401   :  { %377 = shalt.err (!%p374_p6)
}
 0x402   :  { %s378_s20 = scalar_lea.hbm %s488_s4, 32 }
 0x403   :  { %p379_p7 = scmp.ne.s32.totalorder %s488_s4, %s378_s20  ;;  %p382_p8 = scmp.lt.u32.totalorder %s378_s20, %s488_s4 }
 0x405   :  { %p384_p9 = pnand %p382_p8, %p379_p7 }
 0x407   :  { %387 = shalt.err (!%p384_p9)
}
 0x408   :  { %268 = dma.vmem_to_hbm [thread:$0]  %s266_s3, 32, %s488_s4, [#allocation4]  }
 0x409   :  { %392 = dma.done.wait [#allocation4], 32  }
 0x40a   :  { %393 = vsyncadd [#allocation4], 4294967264 }
 0x40b   :  { %272 = vsyncpa [#allocation3], 1 }
 0x40c   :  { %273 = vsyncpa [#allocation6], 1 }
 0x40d   :  { %274 = vsyncpa [#allocation4], 1 }

</bundles_post_ra>
